<compile_context>
chip_gen: v7x
topology: tpu7x:2x2x1
jax: 0.10.0
libtpu: 0.0.40
codegen_flags: <defaults>
</compile_context>

<pallas_src>
import functools

import jax
import jax.numpy as jnp
from jax import lax
from jax.experimental import pallas as pl
from jax.experimental.pallas import tpu as pltpu


def _sepconv_kernel(x_ref, wf_ref, o_ref, p_ref, *,
                    kh_sz, kw_sz, stride, h_out, w_out, c):
    """One grid step = one batch element.

    x_ref : (Wp, Hp*C)            pre-padded input; W on sublanes, (H, C) folded on lanes
    wf_ref: (O, KW*KH*C)          fused depthwise*pointwise weight
    o_ref : (O, Hout*Wout)        output; (h, w) flattened onto the lane axis (lane-dense)
    p_ref : (Hout*Wout, KW*KH*C)  VMEM scratch: im2col patch matrix
    """
    khc = kh_sz * c

    # Build the im2col patch matrix.  Stride along H is a pure lane offset (H is
    # folded into the lane axis), so only the W stride needs strided row access.
    for h in range(h_out):
        lane0 = h * stride * c
        for kw in range(kw_sz):
            if stride == 1:
                p_ref[pl.ds(h * w_out, w_out), pl.ds(kw * khc, khc)] = (
                    x_ref[pl.ds(kw, w_out), pl.ds(lane0, khc)])
            else:
                # Safe per-output-column fallback for strided row access.
                for w in range(w_out):
                    p_ref[pl.ds(h * w_out + w, 1), pl.ds(kw * khc, khc)] = (
                        x_ref[pl.ds(kw + w * stride, 1), pl.ds(lane0, khc)])

    # Single fused matmul on the MXU: (O, K) x (M, K)^T -> (O, M).
    y = lax.dot_general(
        wf_ref[...], p_ref[...],
        dimension_numbers=(((1,), (1,)), ((), ())),
        preferred_element_type=jnp.float32,
    )
    o_ref[...] = y.astype(o_ref.dtype)


def sep_conv2d(x_nchw, dw_weight, pw_weight, *, stride=1, padding=0):
    """SepConv2d forward.

    x_nchw   : (N, C, H, W)       float32
    dw_weight: (C, 1, KH, KW)     depthwise weights (PyTorch layout)
    pw_weight: (O, C, 1, 1)       pointwise weights (PyTorch layout)
    returns  : (N, O, Hout, Wout) float32
    """
    n, c, h, w = x_nchw.shape
    kh_sz, kw_sz = dw_weight.shape[2], dw_weight.shape[3]
    o = pw_weight.shape[0]

    h_out = (h + 2 * padding - kh_sz) // stride + 1
    w_out = (w + 2 * padding - kw_sz) // stride + 1
    hp, wp = h + 2 * padding, w + 2 * padding
    k_dim = kw_sz * kh_sz * c

    # ---- layout plumbing (plain JAX, wrapper side) ----
    # NCHW -> (N, W, H, C), pad spatially, then fold (H, C) onto the lane axis.
    # TODO(synk): for large activations, replace jnp.pad with halo handling via the
    # index_map so the padded copy is never materialized in HBM.
    u = jnp.transpose(x_nchw, (0, 3, 2, 1))                              # (N, W, H, C)
    u = jnp.pad(u, ((0, 0), (padding, padding), (padding, padding), (0, 0)))
    u = u.reshape(n, wp, hp * c)                                         # (N, Wp, Hp*C)

    # Fused weight: wf[o, kw*(KH*C) + kh*C + c] = pw[o, c] * dw[c, kh, kw]
    dw = dw_weight[:, 0, :, :]                                           # (C, KH, KW)
    pw = pw_weight[:, :, 0, 0]                                           # (O, C)
    wf = pw[:, None, None, :] * jnp.transpose(dw, (2, 1, 0))[None, :, :, :]
    wf = wf.reshape(o, k_dim).astype(jnp.float32)                        # (O, K)

    kernel = functools.partial(
        _sepconv_kernel,
        kh_sz=kh_sz, kw_sz=kw_sz, stride=stride, h_out=h_out, w_out=w_out, c=c)

    out = pl.pallas_call(
        kernel,
        out_shape=jax.ShapeDtypeStruct((n, o, h_out * w_out), x_nchw.dtype),
        grid_spec=pltpu.PrefetchScalarGridSpec(
            num_scalar_prefetch=0,
            grid=(n,),
            in_specs=[
                pl.BlockSpec((None, wp, hp * c), lambda b: (b, 0, 0)),
                pl.BlockSpec((o, k_dim), lambda b: (0, 0)),
            ],
            out_specs=pl.BlockSpec((None, o, h_out * w_out), lambda b: (b, 0, 0)),
            scratch_shapes=[pltpu.VMEM((h_out * w_out, k_dim), jnp.float32)],
        ),
        compiler_params=pltpu.CompilerParams(
            dimension_semantics=("parallel",)),
    )(u, wf)

    # (N, O, Hout*Wout) -> NCHW directly; no output transpose needed.
    return out.reshape(n, o, h_out, w_out)


def _reference(x_nchw, dw_weight, pw_weight, *, stride, padding):
    """Pure-JAX reference using lax.conv_general_dilated (matches PyTorch)."""
    c = x_nchw.shape[1]
    y = lax.conv_general_dilated(
        x_nchw, dw_weight,
        window_strides=(stride, stride),
        padding=((padding, padding), (padding, padding)),
        dimension_numbers=("NCHW", "OIHW", "NCHW"),
        feature_group_count=c,
    )
    y = lax.conv_general_dilated(
        y, pw_weight,
        window_strides=(1, 1),
        padding=((0, 0), (0, 0)),
        dimension_numbers=("NCHW", "OIHW", "NCHW"),
    )
    return y


if __name__ == "__main__":
    key = jax.random.PRNGKey(0)
    kx, kdw, kpw = jax.random.split(key, 3)

    # --- main config: SepConv2d(in=4, out=8, kernel_size=3, stride=1, padding=1) ---
    N, C, H, W = 2, 4, 16, 16
    O, K, STRIDE, PAD = 8, 3, 1, 1

    x = jax.random.normal(kx, (N, C, H, W), dtype=jnp.float32)
    dw_w = jax.random.normal(kdw, (C, 1, K, K), dtype=jnp.float32) * 0.1
    pw_w = jax.random.normal(kpw, (O, C, 1, 1), dtype=jnp.float32) * 0.1

    out = jax.block_until_ready(sep_conv2d(x, dw_w, pw_w, stride=STRIDE, padding=PAD))
    ref = _reference(x, dw_w, pw_w, stride=STRIDE, padding=PAD)
    assert out.shape == (N, O, H, W), out.shape
    assert jnp.allclose(out, ref, atol=1e-4, rtol=1e-4), "mismatch vs reference (stride=1)"

    # --- stride=2, asymmetric spatial dims (exercises the strided path) ---
    H2, W2, S2 = 16, 12, 2
    x2 = jax.random.normal(kx, (N, C, H2, W2), dtype=jnp.float32)
    out2 = jax.block_until_ready(sep_conv2d(x2, dw_w, pw_w, stride=S2, padding=PAD))
    ref2 = _reference(x2, dw_w, pw_w, stride=S2, padding=PAD)
    assert out2.shape == ref2.shape, (out2.shape, ref2.shape)
    assert jnp.allclose(out2, ref2, atol=1e-4, rtol=1e-4), "mismatch vs reference (stride=2)"

    print("KERNEL_OK")
</pallas_src>

<mosaic_0001>
module attributes {stable_mosaic.version = 11 : i64} {
  func.func @_sepconv_kernel(%arg0: i32, %arg1: memref<1x18x72xf32, #tpu.memory_space<vmem>>, %arg2: memref<8x36xf32, #tpu.memory_space<vmem>>, %arg3: memref<1x8x256xf32, #tpu.memory_space<vmem>>, %arg4: memref<256x36xf32, #tpu.memory_space<vmem>>) attributes {dimension_semantics = [#tpu.dimension_semantics<parallel>], iteration_bounds = array<i64: 2>, scalar_prefetch = 0 : i64, scratch_operands = 1 : i64, tpu.core_type = #tpu.core_type<tc>, window_params = [{transform_indices = @transform_0, window_bounds = array<i64: 1, 18, 72>}, {pipeline_mode = #tpu.pipeline_mode<synchronous>, transform_indices = @transform_1, window_bounds = array<i64: 8, 36>}, {transform_indices = @transform_2, window_bounds = array<i64: 1, 8, 256>}]} {
    %c0 = arith.constant 0 : index
    %c0_0 = arith.constant 0 : index
    %c0_1 = arith.constant 0 : index
    %0 = vector.load %arg1[%c0, %c0_0, %c0_1] : memref<1x18x72xf32, #tpu.memory_space<vmem>>, vector<1x16x12xf32>
    %1 = vector.shape_cast %0 : vector<1x16x12xf32> to vector<16x12xf32>
    %c0_2 = arith.constant 0 : index
    %c0_3 = arith.constant 0 : index
    %2 = vector.load %arg4[%c0_2, %c0_3] : memref<256x36xf32, #tpu.memory_space<vmem>>, vector<16x12xf32>
    tpu.vector_store %arg4[%c0_2, %c0_3], %1 {strides = array<i32>} : memref<256x36xf32, #tpu.memory_space<vmem>>, vector<16x12xf32>,
    %c0_4 = arith.constant 0 : index
    %c1 = arith.constant 1 : index
    %c0_5 = arith.constant 0 : index
    %3 = vector.load %arg1[%c0_4, %c1, %c0_5] : memref<1x18x72xf32, #tpu.memory_space<vmem>>, vector<1x16x12xf32>
    %4 = vector.shape_cast %3 : vector<1x16x12xf32> to vector<16x12xf32>
    %c0_6 = arith.constant 0 : index
    %c12 = arith.constant 12 : index
    %5 = vector.load %arg4[%c0_6, %c12] : memref<256x36xf32, #tpu.memory_space<vmem>>, vector<16x12xf32>
    tpu.vector_store %arg4[%c0_6, %c12], %4 {strides = array<i32>} : memref<256x36xf32, #tpu.memory_space<vmem>>, vector<16x12xf32>,
    %c0_7 = arith.constant 0 : index
    %c2 = arith.constant 2 : index
    %c0_8 = arith.constant 0 : index
    %6 = vector.load %arg1[%c0_7, %c2, %c0_8] : memref<1x18x72xf32, #tpu.memory_space<vmem>>, vector<1x16x12xf32>
    %7 = vector.shape_cast %6 : vector<1x16x12xf32> to vector<16x12xf32>
    %c0_9 = arith.constant 0 : index
    %c24 = arith.constant 24 : index
    %8 = vector.load %arg4[%c0_9, %c24] : memref<256x36xf32, #tpu.memory_space<vmem>>, vector<16x12xf32>
    tpu.vector_store %arg4[%c0_9, %c24], %7 {strides = array<i32>} : memref<256x36xf32, #tpu.memory_space<vmem>>, vector<16x12xf32>,
    %c0_10 = arith.constant 0 : index
    %c0_11 = arith.constant 0 : index
    %c4 = arith.constant 4 : index
    %9 = vector.load %arg1[%c0_10, %c0_11, %c4] : memref<1x18x72xf32, #tpu.memory_space<vmem>>, vector<1x16x12xf32>
    %10 = vector.shape_cast %9 : vector<1x16x12xf32> to vector<16x12xf32>
    %c16 = arith.constant 16 : index
    %c0_12 = arith.constant 0 : index
    %11 = vector.load %arg4[%c16, %c0_12] : memref<256x36xf32, #tpu.memory_space<vmem>>, vector<16x12xf32>
    tpu.vector_store %arg4[%c16, %c0_12], %10 {strides = array<i32>} : memref<256x36xf32, #tpu.memory_space<vmem>>, vector<16x12xf32>,
    %c0_13 = arith.constant 0 : index
    %c1_14 = arith.constant 1 : index
    %c4_15 = arith.constant 4 : index
    %12 = vector.load %arg1[%c0_13, %c1_14, %c4_15] : memref<1x18x72xf32, #tpu.memory_space<vmem>>, vector<1x16x12xf32>
    %13 = vector.shape_cast %12 : vector<1x16x12xf32> to vector<16x12xf32>
    %c16_16 = arith.constant 16 : index
    %c12_17 = arith.constant 12 : index
    %14 = vector.load %arg4[%c16_16, %c12_17] : memref<256x36xf32, #tpu.memory_space<vmem>>, vector<16x12xf32>
    tpu.vector_store %arg4[%c16_16, %c12_17], %13 {strides = array<i32>} : memref<256x36xf32, #tpu.memory_space<vmem>>, vector<16x12xf32>,
    %c0_18 = arith.constant 0 : index
    %c2_19 = arith.constant 2 : index
    %c4_20 = arith.constant 4 : index
    %15 = vector.load %arg1[%c0_18, %c2_19, %c4_20] : memref<1x18x72xf32, #tpu.memory_space<vmem>>, vector<1x16x12xf32>
    %16 = vector.shape_cast %15 : vector<1x16x12xf32> to vector<16x12xf32>
    %c16_21 = arith.constant 16 : index
    %c24_22 = arith.constant 24 : index
    %17 = vector.load %arg4[%c16_21, %c24_22] : memref<256x36xf32, #tpu.memory_space<vmem>>, vector<16x12xf32>
    tpu.vector_store %arg4[%c16_21, %c24_22], %16 {strides = array<i32>} : memref<256x36xf32, #tpu.memory_space<vmem>>, vector<16x12xf32>,
    %c0_23 = arith.constant 0 : index
    %c0_24 = arith.constant 0 : index
    %c8 = arith.constant 8 : index
    %18 = vector.load %arg1[%c0_23, %c0_24, %c8] : memref<1x18x72xf32, #tpu.memory_space<vmem>>, vector<1x16x12xf32>
    %19 = vector.shape_cast %18 : vector<1x16x12xf32> to vector<16x12xf32>
    %c32 = arith.constant 32 : index
    %c0_25 = arith.constant 0 : index
    %20 = vector.load %arg4[%c32, %c0_25] : memref<256x36xf32, #tpu.memory_space<vmem>>, vector<16x12xf32>
    tpu.vector_store %arg4[%c32, %c0_25], %19 {strides = array<i32>} : memref<256x36xf32, #tpu.memory_space<vmem>>, vector<16x12xf32>,
    %c0_26 = arith.constant 0 : index
    %c1_27 = arith.constant 1 : index
    %c8_28 = arith.constant 8 : index
    %21 = vector.load %arg1[%c0_26, %c1_27, %c8_28] : memref<1x18x72xf32, #tpu.memory_space<vmem>>, vector<1x16x12xf32>
    %22 = vector.shape_cast %21 : vector<1x16x12xf32> to vector<16x12xf32>
    %c32_29 = arith.constant 32 : index
    %c12_30 = arith.constant 12 : index
    %23 = vector.load %arg4[%c32_29, %c12_30] : memref<256x36xf32, #tpu.memory_space<vmem>>, vector<16x12xf32>
    tpu.vector_store %arg4[%c32_29, %c12_30], %22 {strides = array<i32>} : memref<256x36xf32, #tpu.memory_space<vmem>>, vector<16x12xf32>,
    %c0_31 = arith.constant 0 : index
    %c2_32 = arith.constant 2 : index
    %c8_33 = arith.constant 8 : index
    %24 = vector.load %arg1[%c0_31, %c2_32, %c8_33] : memref<1x18x72xf32, #tpu.memory_space<vmem>>, vector<1x16x12xf32>
    %25 = vector.shape_cast %24 : vector<1x16x12xf32> to vector<16x12xf32>
    %c32_34 = arith.constant 32 : index
    %c24_35 = arith.constant 24 : index
    %26 = vector.load %arg4[%c32_34, %c24_35] : memref<256x36xf32, #tpu.memory_space<vmem>>, vector<16x12xf32>
    tpu.vector_store %arg4[%c32_34, %c24_35], %25 {strides = array<i32>} : memref<256x36xf32, #tpu.memory_space<vmem>>, vector<16x12xf32>,
    %c0_36 = arith.constant 0 : index
    %c0_37 = arith.constant 0 : index
    %c12_38 = arith.constant 12 : index
    %27 = vector.load %arg1[%c0_36, %c0_37, %c12_38] : memref<1x18x72xf32, #tpu.memory_space<vmem>>, vector<1x16x12xf32>
    %28 = vector.shape_cast %27 : vector<1x16x12xf32> to vector<16x12xf32>
    %c48 = arith.constant 48 : index
    %c0_39 = arith.constant 0 : index
    %29 = vector.load %arg4[%c48, %c0_39] : memref<256x36xf32, #tpu.memory_space<vmem>>, vector<16x12xf32>
    tpu.vector_store %arg4[%c48, %c0_39], %28 {strides = array<i32>} : memref<256x36xf32, #tpu.memory_space<vmem>>, vector<16x12xf32>,
    %c0_40 = arith.constant 0 : index
    %c1_41 = arith.constant 1 : index
    %c12_42 = arith.constant 12 : index
    %30 = vector.load %arg1[%c0_40, %c1_41, %c12_42] : memref<1x18x72xf32, #tpu.memory_space<vmem>>, vector<1x16x12xf32>
    %31 = vector.shape_cast %30 : vector<1x16x12xf32> to vector<16x12xf32>
    %c48_43 = arith.constant 48 : index
    %c12_44 = arith.constant 12 : index
    %32 = vector.load %arg4[%c48_43, %c12_44] : memref<256x36xf32, #tpu.memory_space<vmem>>, vector<16x12xf32>
    tpu.vector_store %arg4[%c48_43, %c12_44], %31 {strides = array<i32>} : memref<256x36xf32, #tpu.memory_space<vmem>>, vector<16x12xf32>,
    %c0_45 = arith.constant 0 : index
    %c2_46 = arith.constant 2 : index
    %c12_47 = arith.constant 12 : index
    %33 = vector.load %arg1[%c0_45, %c2_46, %c12_47] : memref<1x18x72xf32, #tpu.memory_space<vmem>>, vector<1x16x12xf32>
    %34 = vector.shape_cast %33 : vector<1x16x12xf32> to vector<16x12xf32>
    %c48_48 = arith.constant 48 : index
    %c24_49 = arith.constant 24 : index
    %35 = vector.load %arg4[%c48_48, %c24_49] : memref<256x36xf32, #tpu.memory_space<vmem>>, vector<16x12xf32>
    tpu.vector_store %arg4[%c48_48, %c24_49], %34 {strides = array<i32>} : memref<256x36xf32, #tpu.memory_space<vmem>>, vector<16x12xf32>,
    %c0_50 = arith.constant 0 : index
    %c0_51 = arith.constant 0 : index
    %c16_52 = arith.constant 16 : index
    %36 = vector.load %arg1[%c0_50, %c0_51, %c16_52] : memref<1x18x72xf32, #tpu.memory_space<vmem>>, vector<1x16x12xf32>
    %37 = vector.shape_cast %36 : vector<1x16x12xf32> to vector<16x12xf32>
    %c64 = arith.constant 64 : index
    %c0_53 = arith.constant 0 : index
    %38 = vector.load %arg4[%c64, %c0_53] : memref<256x36xf32, #tpu.memory_space<vmem>>, vector<16x12xf32>
    tpu.vector_store %arg4[%c64, %c0_53], %37 {strides = array<i32>} : memref<256x36xf32, #tpu.memory_space<vmem>>, vector<16x12xf32>,
    %c0_54 = arith.constant 0 : index
    %c1_55 = arith.constant 1 : index
    %c16_56 = arith.constant 16 : index
    %39 = vector.load %arg1[%c0_54, %c1_55, %c16_56] : memref<1x18x72xf32, #tpu.memory_space<vmem>>, vector<1x16x12xf32>
    %40 = vector.shape_cast %39 : vector<1x16x12xf32> to vector<16x12xf32>
    %c64_57 = arith.constant 64 : index
    %c12_58 = arith.constant 12 : index
    %41 = vector.load %arg4[%c64_57, %c12_58] : memref<256x36xf32, #tpu.memory_space<vmem>>, vector<16x12xf32>
    tpu.vector_store %arg4[%c64_57, %c12_58], %40 {strides = array<i32>} : memref<256x36xf32, #tpu.memory_space<vmem>>, vector<16x12xf32>,
    %c0_59 = arith.constant 0 : index
    %c2_60 = arith.constant 2 : index
    %c16_61 = arith.constant 16 : index
    %42 = vector.load %arg1[%c0_59, %c2_60, %c16_61] : memref<1x18x72xf32, #tpu.memory_space<vmem>>, vector<1x16x12xf32>
    %43 = vector.shape_cast %42 : vector<1x16x12xf32> to vector<16x12xf32>
    %c64_62 = arith.constant 64 : index
    %c24_63 = arith.constant 24 : index
    %44 = vector.load %arg4[%c64_62, %c24_63] : memref<256x36xf32, #tpu.memory_space<vmem>>, vector<16x12xf32>
    tpu.vector_store %arg4[%c64_62, %c24_63], %43 {strides = array<i32>} : memref<256x36xf32, #tpu.memory_space<vmem>>, vector<16x12xf32>,
    %c0_64 = arith.constant 0 : index
    %c0_65 = arith.constant 0 : index
    %c20 = arith.constant 20 : index
    %45 = vector.load %arg1[%c0_64, %c0_65, %c20] : memref<1x18x72xf32, #tpu.memory_space<vmem>>, vector<1x16x12xf32>
    %46 = vector.shape_cast %45 : vector<1x16x12xf32> to vector<16x12xf32>
    %c80 = arith.constant 80 : index
    %c0_66 = arith.constant 0 : index
    %47 = vector.load %arg4[%c80, %c0_66] : memref<256x36xf32, #tpu.memory_space<vmem>>, vector<16x12xf32>
    tpu.vector_store %arg4[%c80, %c0_66], %46 {strides = array<i32>} : memref<256x36xf32, #tpu.memory_space<vmem>>, vector<16x12xf32>,
    %c0_67 = arith.constant 0 : index
    %c1_68 = arith.constant 1 : index
    %c20_69 = arith.constant 20 : index
    %48 = vector.load %arg1[%c0_67, %c1_68, %c20_69] : memref<1x18x72xf32, #tpu.memory_space<vmem>>, vector<1x16x12xf32>
    %49 = vector.shape_cast %48 : vector<1x16x12xf32> to vector<16x12xf32>
    %c80_70 = arith.constant 80 : index
    %c12_71 = arith.constant 12 : index
    %50 = vector.load %arg4[%c80_70, %c12_71] : memref<256x36xf32, #tpu.memory_space<vmem>>, vector<16x12xf32>
    tpu.vector_store %arg4[%c80_70, %c12_71], %49 {strides = array<i32>} : memref<256x36xf32, #tpu.memory_space<vmem>>, vector<16x12xf32>,
    %c0_72 = arith.constant 0 : index
    %c2_73 = arith.constant 2 : index
    %c20_74 = arith.constant 20 : index
    %51 = vector.load %arg1[%c0_72, %c2_73, %c20_74] : memref<1x18x72xf32, #tpu.memory_space<vmem>>, vector<1x16x12xf32>
    %52 = vector.shape_cast %51 : vector<1x16x12xf32> to vector<16x12xf32>
    %c80_75 = arith.constant 80 : index
    %c24_76 = arith.constant 24 : index
    %53 = vector.load %arg4[%c80_75, %c24_76] : memref<256x36xf32, #tpu.memory_space<vmem>>, vector<16x12xf32>
    tpu.vector_store %arg4[%c80_75, %c24_76], %52 {strides = array<i32>} : memref<256x36xf32, #tpu.memory_space<vmem>>, vector<16x12xf32>,
    %c0_77 = arith.constant 0 : index
    %c0_78 = arith.constant 0 : index
    %c24_79 = arith.constant 24 : index
    %54 = vector.load %arg1[%c0_77, %c0_78, %c24_79] : memref<1x18x72xf32, #tpu.memory_space<vmem>>, vector<1x16x12xf32>
    %55 = vector.shape_cast %54 : vector<1x16x12xf32> to vector<16x12xf32>
    %c96 = arith.constant 96 : index
    %c0_80 = arith.constant 0 : index
    %56 = vector.load %arg4[%c96, %c0_80] : memref<256x36xf32, #tpu.memory_space<vmem>>, vector<16x12xf32>
    tpu.vector_store %arg4[%c96, %c0_80], %55 {strides = array<i32>} : memref<256x36xf32, #tpu.memory_space<vmem>>, vector<16x12xf32>,
    %c0_81 = arith.constant 0 : index
    %c1_82 = arith.constant 1 : index
    %c24_83 = arith.constant 24 : index
    %57 = vector.load %arg1[%c0_81, %c1_82, %c24_83] : memref<1x18x72xf32, #tpu.memory_space<vmem>>, vector<1x16x12xf32>
    %58 = vector.shape_cast %57 : vector<1x16x12xf32> to vector<16x12xf32>
    %c96_84 = arith.constant 96 : index
    %c12_85 = arith.constant 12 : index
    %59 = vector.load %arg4[%c96_84, %c12_85] : memref<256x36xf32, #tpu.memory_space<vmem>>, vector<16x12xf32>
    tpu.vector_store %arg4[%c96_84, %c12_85], %58 {strides = array<i32>} : memref<256x36xf32, #tpu.memory_space<vmem>>, vector<16x12xf32>,
    %c0_86 = arith.constant 0 : index
    %c2_87 = arith.constant 2 : index
    %c24_88 = arith.constant 24 : index
    %60 = vector.load %arg1[%c0_86, %c2_87, %c24_88] : memref<1x18x72xf32, #tpu.memory_space<vmem>>, vector<1x16x12xf32>
    %61 = vector.shape_cast %60 : vector<1x16x12xf32> to vector<16x12xf32>
    %c96_89 = arith.constant 96 : index
    %c24_90 = arith.constant 24 : index
    %62 = vector.load %arg4[%c96_89, %c24_90] : memref<256x36xf32, #tpu.memory_space<vmem>>, vector<16x12xf32>
    tpu.vector_store %arg4[%c96_89, %c24_90], %61 {strides = array<i32>} : memref<256x36xf32, #tpu.memory_space<vmem>>, vector<16x12xf32>,
    %c0_91 = arith.constant 0 : index
    %c0_92 = arith.constant 0 : index
    %c28 = arith.constant 28 : index
    %63 = vector.load %arg1[%c0_91, %c0_92, %c28] : memref<1x18x72xf32, #tpu.memory_space<vmem>>, vector<1x16x12xf32>
    %64 = vector.shape_cast %63 : vector<1x16x12xf32> to vector<16x12xf32>
    %c112 = arith.constant 112 : index
    %c0_93 = arith.constant 0 : index
    %65 = vector.load %arg4[%c112, %c0_93] : memref<256x36xf32, #tpu.memory_space<vmem>>, vector<16x12xf32>
    tpu.vector_store %arg4[%c112, %c0_93], %64 {strides = array<i32>} : memref<256x36xf32, #tpu.memory_space<vmem>>, vector<16x12xf32>,
    %c0_94 = arith.constant 0 : index
    %c1_95 = arith.constant 1 : index
    %c28_96 = arith.constant 28 : index
    %66 = vector.load %arg1[%c0_94, %c1_95, %c28_96] : memref<1x18x72xf32, #tpu.memory_space<vmem>>, vector<1x16x12xf32>
    %67 = vector.shape_cast %66 : vector<1x16x12xf32> to vector<16x12xf32>
    %c112_97 = arith.constant 112 : index
    %c12_98 = arith.constant 12 : index
    %68 = vector.load %arg4[%c112_97, %c12_98] : memref<256x36xf32, #tpu.memory_space<vmem>>, vector<16x12xf32>
    tpu.vector_store %arg4[%c112_97, %c12_98], %67 {strides = array<i32>} : memref<256x36xf32, #tpu.memory_space<vmem>>, vector<16x12xf32>,
    %c0_99 = arith.constant 0 : index
    %c2_100 = arith.constant 2 : index
    %c28_101 = arith.constant 28 : index
    %69 = vector.load %arg1[%c0_99, %c2_100, %c28_101] : memref<1x18x72xf32, #tpu.memory_space<vmem>>, vector<1x16x12xf32>
    %70 = vector.shape_cast %69 : vector<1x16x12xf32> to vector<16x12xf32>
    %c112_102 = arith.constant 112 : index
    %c24_103 = arith.constant 24 : index
    %71 = vector.load %arg4[%c112_102, %c24_103] : memref<256x36xf32, #tpu.memory_space<vmem>>, vector<16x12xf32>
    tpu.vector_store %arg4[%c112_102, %c24_103], %70 {strides = array<i32>} : memref<256x36xf32, #tpu.memory_space<vmem>>, vector<16x12xf32>,
    %c0_104 = arith.constant 0 : index
    %c0_105 = arith.constant 0 : index
    %c32_106 = arith.constant 32 : index
    %72 = vector.load %arg1[%c0_104, %c0_105, %c32_106] : memref<1x18x72xf32, #tpu.memory_space<vmem>>, vector<1x16x12xf32>
    %73 = vector.shape_cast %72 : vector<1x16x12xf32> to vector<16x12xf32>
    %c128 = arith.constant 128 : index
    %c0_107 = arith.constant 0 : index
    %74 = vector.load %arg4[%c128, %c0_107] : memref<256x36xf32, #tpu.memory_space<vmem>>, vector<16x12xf32>
    tpu.vector_store %arg4[%c128, %c0_107], %73 {strides = array<i32>} : memref<256x36xf32, #tpu.memory_space<vmem>>, vector<16x12xf32>,
    %c0_108 = arith.constant 0 : index
    %c1_109 = arith.constant 1 : index
    %c32_110 = arith.constant 32 : index
    %75 = vector.load %arg1[%c0_108, %c1_109, %c32_110] : memref<1x18x72xf32, #tpu.memory_space<vmem>>, vector<1x16x12xf32>
    %76 = vector.shape_cast %75 : vector<1x16x12xf32> to vector<16x12xf32>
    %c128_111 = arith.constant 128 : index
    %c12_112 = arith.constant 12 : index
    %77 = vector.load %arg4[%c128_111, %c12_112] : memref<256x36xf32, #tpu.memory_space<vmem>>, vector<16x12xf32>
    tpu.vector_store %arg4[%c128_111, %c12_112], %76 {strides = array<i32>} : memref<256x36xf32, #tpu.memory_space<vmem>>, vector<16x12xf32>,
    %c0_113 = arith.constant 0 : index
    %c2_114 = arith.constant 2 : index
    %c32_115 = arith.constant 32 : index
    %78 = vector.load %arg1[%c0_113, %c2_114, %c32_115] : memref<1x18x72xf32, #tpu.memory_space<vmem>>, vector<1x16x12xf32>
    %79 = vector.shape_cast %78 : vector<1x16x12xf32> to vector<16x12xf32>
    %c128_116 = arith.constant 128 : index
    %c24_117 = arith.constant 24 : index
    %80 = vector.load %arg4[%c128_116, %c24_117] : memref<256x36xf32, #tpu.memory_space<vmem>>, vector<16x12xf32>
    tpu.vector_store %arg4[%c128_116, %c24_117], %79 {strides = array<i32>} : memref<256x36xf32, #tpu.memory_space<vmem>>, vector<16x12xf32>,
    %c0_118 = arith.constant 0 : index
    %c0_119 = arith.constant 0 : index
    %c36 = arith.constant 36 : index
    %81 = vector.load %arg1[%c0_118, %c0_119, %c36] : memref<1x18x72xf32, #tpu.memory_space<vmem>>, vector<1x16x12xf32>
    %82 = vector.shape_cast %81 : vector<1x16x12xf32> to vector<16x12xf32>
    %c144 = arith.constant 144 : index
    %c0_120 = arith.constant 0 : index
    %83 = vector.load %arg4[%c144, %c0_120] : memref<256x36xf32, #tpu.memory_space<vmem>>, vector<16x12xf32>
    tpu.vector_store %arg4[%c144, %c0_120], %82 {strides = array<i32>} : memref<256x36xf32, #tpu.memory_space<vmem>>, vector<16x12xf32>,
    %c0_121 = arith.constant 0 : index
    %c1_122 = arith.constant 1 : index
    %c36_123 = arith.constant 36 : index
    %84 = vector.load %arg1[%c0_121, %c1_122, %c36_123] : memref<1x18x72xf32, #tpu.memory_space<vmem>>, vector<1x16x12xf32>
    %85 = vector.shape_cast %84 : vector<1x16x12xf32> to vector<16x12xf32>
    %c144_124 = arith.constant 144 : index
    %c12_125 = arith.constant 12 : index
    %86 = vector.load %arg4[%c144_124, %c12_125] : memref<256x36xf32, #tpu.memory_space<vmem>>, vector<16x12xf32>
    tpu.vector_store %arg4[%c144_124, %c12_125], %85 {strides = array<i32>} : memref<256x36xf32, #tpu.memory_space<vmem>>, vector<16x12xf32>,
    %c0_126 = arith.constant 0 : index
    %c2_127 = arith.constant 2 : index
    %c36_128 = arith.constant 36 : index
    %87 = vector.load %arg1[%c0_126, %c2_127, %c36_128] : memref<1x18x72xf32, #tpu.memory_space<vmem>>, vector<1x16x12xf32>
    %88 = vector.shape_cast %87 : vector<1x16x12xf32> to vector<16x12xf32>
    %c144_129 = arith.constant 144 : index
    %c24_130 = arith.constant 24 : index
    %89 = vector.load %arg4[%c144_129, %c24_130] : memref<256x36xf32, #tpu.memory_space<vmem>>, vector<16x12xf32>
    tpu.vector_store %arg4[%c144_129, %c24_130], %88 {strides = array<i32>} : memref<256x36xf32, #tpu.memory_space<vmem>>, vector<16x12xf32>,
    %c0_131 = arith.constant 0 : index
    %c0_132 = arith.constant 0 : index
    %c40 = arith.constant 40 : index
    %90 = vector.load %arg1[%c0_131, %c0_132, %c40] : memref<1x18x72xf32, #tpu.memory_space<vmem>>, vector<1x16x12xf32>
    %91 = vector.shape_cast %90 : vector<1x16x12xf32> to vector<16x12xf32>
    %c160 = arith.constant 160 : index
    %c0_133 = arith.constant 0 : index
    %92 = vector.load %arg4[%c160, %c0_133] : memref<256x36xf32, #tpu.memory_space<vmem>>, vector<16x12xf32>
    tpu.vector_store %arg4[%c160, %c0_133], %91 {strides = array<i32>} : memref<256x36xf32, #tpu.memory_space<vmem>>, vector<16x12xf32>,
    %c0_134 = arith.constant 0 : index
    %c1_135 = arith.constant 1 : index
    %c40_136 = arith.constant 40 : index
    %93 = vector.load %arg1[%c0_134, %c1_135, %c40_136] : memref<1x18x72xf32, #tpu.memory_space<vmem>>, vector<1x16x12xf32>
    %94 = vector.shape_cast %93 : vector<1x16x12xf32> to vector<16x12xf32>
    %c160_137 = arith.constant 160 : index
    %c12_138 = arith.constant 12 : index
    %95 = vector.load %arg4[%c160_137, %c12_138] : memref<256x36xf32, #tpu.memory_space<vmem>>, vector<16x12xf32>
    tpu.vector_store %arg4[%c160_137, %c12_138], %94 {strides = array<i32>} : memref<256x36xf32, #tpu.memory_space<vmem>>, vector<16x12xf32>,
    %c0_139 = arith.constant 0 : index
    %c2_140 = arith.constant 2 : index
    %c40_141 = arith.constant 40 : index
    %96 = vector.load %arg1[%c0_139, %c2_140, %c40_141] : memref<1x18x72xf32, #tpu.memory_space<vmem>>, vector<1x16x12xf32>
    %97 = vector.shape_cast %96 : vector<1x16x12xf32> to vector<16x12xf32>
    %c160_142 = arith.constant 160 : index
    %c24_143 = arith.constant 24 : index
    %98 = vector.load %arg4[%c160_142, %c24_143] : memref<256x36xf32, #tpu.memory_space<vmem>>, vector<16x12xf32>
    tpu.vector_store %arg4[%c160_142, %c24_143], %97 {strides = array<i32>} : memref<256x36xf32, #tpu.memory_space<vmem>>, vector<16x12xf32>,
    %c0_144 = arith.constant 0 : index
    %c0_145 = arith.constant 0 : index
    %c44 = arith.constant 44 : index
    %99 = vector.load %arg1[%c0_144, %c0_145, %c44] : memref<1x18x72xf32, #tpu.memory_space<vmem>>, vector<1x16x12xf32>
    %100 = vector.shape_cast %99 : vector<1x16x12xf32> to vector<16x12xf32>
    %c176 = arith.constant 176 : index
    %c0_146 = arith.constant 0 : index
    %101 = vector.load %arg4[%c176, %c0_146] : memref<256x36xf32, #tpu.memory_space<vmem>>, vector<16x12xf32>
    tpu.vector_store %arg4[%c176, %c0_146], %100 {strides = array<i32>} : memref<256x36xf32, #tpu.memory_space<vmem>>, vector<16x12xf32>,
    %c0_147 = arith.constant 0 : index
    %c1_148 = arith.constant 1 : index
    %c44_149 = arith.constant 44 : index
    %102 = vector.load %arg1[%c0_147, %c1_148, %c44_149] : memref<1x18x72xf32, #tpu.memory_space<vmem>>, vector<1x16x12xf32>
    %103 = vector.shape_cast %102 : vector<1x16x12xf32> to vector<16x12xf32>
    %c176_150 = arith.constant 176 : index
    %c12_151 = arith.constant 12 : index
    %104 = vector.load %arg4[%c176_150, %c12_151] : memref<256x36xf32, #tpu.memory_space<vmem>>, vector<16x12xf32>
    tpu.vector_store %arg4[%c176_150, %c12_151], %103 {strides = array<i32>} : memref<256x36xf32, #tpu.memory_space<vmem>>, vector<16x12xf32>,
    %c0_152 = arith.constant 0 : index
    %c2_153 = arith.constant 2 : index
    %c44_154 = arith.constant 44 : index
    %105 = vector.load %arg1[%c0_152, %c2_153, %c44_154] : memref<1x18x72xf32, #tpu.memory_space<vmem>>, vector<1x16x12xf32>
    %106 = vector.shape_cast %105 : vector<1x16x12xf32> to vector<16x12xf32>
    %c176_155 = arith.constant 176 : index
    %c24_156 = arith.constant 24 : index
    %107 = vector.load %arg4[%c176_155, %c24_156] : memref<256x36xf32, #tpu.memory_space<vmem>>, vector<16x12xf32>
    tpu.vector_store %arg4[%c176_155, %c24_156], %106 {strides = array<i32>} : memref<256x36xf32, #tpu.memory_space<vmem>>, vector<16x12xf32>,
    %c0_157 = arith.constant 0 : index
    %c0_158 = arith.constant 0 : index
    %c48_159 = arith.constant 48 : index
    %108 = vector.load %arg1[%c0_157, %c0_158, %c48_159] : memref<1x18x72xf32, #tpu.memory_space<vmem>>, vector<1x16x12xf32>
    %109 = vector.shape_cast %108 : vector<1x16x12xf32> to vector<16x12xf32>
    %c192 = arith.constant 192 : index
    %c0_160 = arith.constant 0 : index
    %110 = vector.load %arg4[%c192, %c0_160] : memref<256x36xf32, #tpu.memory_space<vmem>>, vector<16x12xf32>
    tpu.vector_store %arg4[%c192, %c0_160], %109 {strides = array<i32>} : memref<256x36xf32, #tpu.memory_space<vmem>>, vector<16x12xf32>,
    %c0_161 = arith.constant 0 : index
    %c1_162 = arith.constant 1 : index
    %c48_163 = arith.constant 48 : index
    %111 = vector.load %arg1[%c0_161, %c1_162, %c48_163] : memref<1x18x72xf32, #tpu.memory_space<vmem>>, vector<1x16x12xf32>
    %112 = vector.shape_cast %111 : vector<1x16x12xf32> to vector<16x12xf32>
    %c192_164 = arith.constant 192 : index
    %c12_165 = arith.constant 12 : index
    %113 = vector.load %arg4[%c192_164, %c12_165] : memref<256x36xf32, #tpu.memory_space<vmem>>, vector<16x12xf32>
    tpu.vector_store %arg4[%c192_164, %c12_165], %112 {strides = array<i32>} : memref<256x36xf32, #tpu.memory_space<vmem>>, vector<16x12xf32>,
    %c0_166 = arith.constant 0 : index
    %c2_167 = arith.constant 2 : index
    %c48_168 = arith.constant 48 : index
    %114 = vector.load %arg1[%c0_166, %c2_167, %c48_168] : memref<1x18x72xf32, #tpu.memory_space<vmem>>, vector<1x16x12xf32>
    %115 = vector.shape_cast %114 : vector<1x16x12xf32> to vector<16x12xf32>
    %c192_169 = arith.constant 192 : index
    %c24_170 = arith.constant 24 : index
    %116 = vector.load %arg4[%c192_169, %c24_170] : memref<256x36xf32, #tpu.memory_space<vmem>>, vector<16x12xf32>
    tpu.vector_store %arg4[%c192_169, %c24_170], %115 {strides = array<i32>} : memref<256x36xf32, #tpu.memory_space<vmem>>, vector<16x12xf32>,
    %c0_171 = arith.constant 0 : index
    %c0_172 = arith.constant 0 : index
    %c52 = arith.constant 52 : index
    %117 = vector.load %arg1[%c0_171, %c0_172, %c52] : memref<1x18x72xf32, #tpu.memory_space<vmem>>, vector<1x16x12xf32>
    %118 = vector.shape_cast %117 : vector<1x16x12xf32> to vector<16x12xf32>
    %c208 = arith.constant 208 : index
    %c0_173 = arith.constant 0 : index
    %119 = vector.load %arg4[%c208, %c0_173] : memref<256x36xf32, #tpu.memory_space<vmem>>, vector<16x12xf32>
    tpu.vector_store %arg4[%c208, %c0_173], %118 {strides = array<i32>} : memref<256x36xf32, #tpu.memory_space<vmem>>, vector<16x12xf32>,
    %c0_174 = arith.constant 0 : index
    %c1_175 = arith.constant 1 : index
    %c52_176 = arith.constant 52 : index
    %120 = vector.load %arg1[%c0_174, %c1_175, %c52_176] : memref<1x18x72xf32, #tpu.memory_space<vmem>>, vector<1x16x12xf32>
    %121 = vector.shape_cast %120 : vector<1x16x12xf32> to vector<16x12xf32>
    %c208_177 = arith.constant 208 : index
    %c12_178 = arith.constant 12 : index
    %122 = vector.load %arg4[%c208_177, %c12_178] : memref<256x36xf32, #tpu.memory_space<vmem>>, vector<16x12xf32>
    tpu.vector_store %arg4[%c208_177, %c12_178], %121 {strides = array<i32>} : memref<256x36xf32, #tpu.memory_space<vmem>>, vector<16x12xf32>,
    %c0_179 = arith.constant 0 : index
    %c2_180 = arith.constant 2 : index
    %c52_181 = arith.constant 52 : index
    %123 = vector.load %arg1[%c0_179, %c2_180, %c52_181] : memref<1x18x72xf32, #tpu.memory_space<vmem>>, vector<1x16x12xf32>
    %124 = vector.shape_cast %123 : vector<1x16x12xf32> to vector<16x12xf32>
    %c208_182 = arith.constant 208 : index
    %c24_183 = arith.constant 24 : index
    %125 = vector.load %arg4[%c208_182, %c24_183] : memref<256x36xf32, #tpu.memory_space<vmem>>, vector<16x12xf32>
    tpu.vector_store %arg4[%c208_182, %c24_183], %124 {strides = array<i32>} : memref<256x36xf32, #tpu.memory_space<vmem>>, vector<16x12xf32>,
    %c0_184 = arith.constant 0 : index
    %c0_185 = arith.constant 0 : index
    %c56 = arith.constant 56 : index
    %126 = vector.load %arg1[%c0_184, %c0_185, %c56] : memref<1x18x72xf32, #tpu.memory_space<vmem>>, vector<1x16x12xf32>
    %127 = vector.shape_cast %126 : vector<1x16x12xf32> to vector<16x12xf32>
    %c224 = arith.constant 224 : index
    %c0_186 = arith.constant 0 : index
    %128 = vector.load %arg4[%c224, %c0_186] : memref<256x36xf32, #tpu.memory_space<vmem>>, vector<16x12xf32>
    tpu.vector_store %arg4[%c224, %c0_186], %127 {strides = array<i32>} : memref<256x36xf32, #tpu.memory_space<vmem>>, vector<16x12xf32>,
    %c0_187 = arith.constant 0 : index
    %c1_188 = arith.constant 1 : index
    %c56_189 = arith.constant 56 : index
    %129 = vector.load %arg1[%c0_187, %c1_188, %c56_189] : memref<1x18x72xf32, #tpu.memory_space<vmem>>, vector<1x16x12xf32>
    %130 = vector.shape_cast %129 : vector<1x16x12xf32> to vector<16x12xf32>
    %c224_190 = arith.constant 224 : index
    %c12_191 = arith.constant 12 : index
    %131 = vector.load %arg4[%c224_190, %c12_191] : memref<256x36xf32, #tpu.memory_space<vmem>>, vector<16x12xf32>
    tpu.vector_store %arg4[%c224_190, %c12_191], %130 {strides = array<i32>} : memref<256x36xf32, #tpu.memory_space<vmem>>, vector<16x12xf32>,
    %c0_192 = arith.constant 0 : index
    %c2_193 = arith.constant 2 : index
    %c56_194 = arith.constant 56 : index
    %132 = vector.load %arg1[%c0_192, %c2_193, %c56_194] : memref<1x18x72xf32, #tpu.memory_space<vmem>>, vector<1x16x12xf32>
    %133 = vector.shape_cast %132 : vector<1x16x12xf32> to vector<16x12xf32>
    %c224_195 = arith.constant 224 : index
    %c24_196 = arith.constant 24 : index
    %134 = vector.load %arg4[%c224_195, %c24_196] : memref<256x36xf32, #tpu.memory_space<vmem>>, vector<16x12xf32>
    tpu.vector_store %arg4[%c224_195, %c24_196], %133 {strides = array<i32>} : memref<256x36xf32, #tpu.memory_space<vmem>>, vector<16x12xf32>,
    %c0_197 = arith.constant 0 : index
    %c0_198 = arith.constant 0 : index
    %c60 = arith.constant 60 : index
    %135 = vector.load %arg1[%c0_197, %c0_198, %c60] : memref<1x18x72xf32, #tpu.memory_space<vmem>>, vector<1x16x12xf32>
    %136 = vector.shape_cast %135 : vector<1x16x12xf32> to vector<16x12xf32>
    %c240 = arith.constant 240 : index
    %c0_199 = arith.constant 0 : index
    %137 = vector.load %arg4[%c240, %c0_199] : memref<256x36xf32, #tpu.memory_space<vmem>>, vector<16x12xf32>
    tpu.vector_store %arg4[%c240, %c0_199], %136 {strides = array<i32>} : memref<256x36xf32, #tpu.memory_space<vmem>>, vector<16x12xf32>,
    %c0_200 = arith.constant 0 : index
    %c1_201 = arith.constant 1 : index
    %c60_202 = arith.constant 60 : index
    %138 = vector.load %arg1[%c0_200, %c1_201, %c60_202] : memref<1x18x72xf32, #tpu.memory_space<vmem>>, vector<1x16x12xf32>
    %139 = vector.shape_cast %138 : vector<1x16x12xf32> to vector<16x12xf32>
    %c240_203 = arith.constant 240 : index
    %c12_204 = arith.constant 12 : index
    %140 = vector.load %arg4[%c240_203, %c12_204] : memref<256x36xf32, #tpu.memory_space<vmem>>, vector<16x12xf32>
    tpu.vector_store %arg4[%c240_203, %c12_204], %139 {strides = array<i32>} : memref<256x36xf32, #tpu.memory_space<vmem>>, vector<16x12xf32>,
    %c0_205 = arith.constant 0 : index
    %c2_206 = arith.constant 2 : index
    %c60_207 = arith.constant 60 : index
    %141 = vector.load %arg1[%c0_205, %c2_206, %c60_207] : memref<1x18x72xf32, #tpu.memory_space<vmem>>, vector<1x16x12xf32>
    %142 = vector.shape_cast %141 : vector<1x16x12xf32> to vector<16x12xf32>
    %c240_208 = arith.constant 240 : index
    %c24_209 = arith.constant 24 : index
    %143 = vector.load %arg4[%c240_208, %c24_209] : memref<256x36xf32, #tpu.memory_space<vmem>>, vector<16x12xf32>
    tpu.vector_store %arg4[%c240_208, %c24_209], %142 {strides = array<i32>} : memref<256x36xf32, #tpu.memory_space<vmem>>, vector<16x12xf32>,
    %c0_210 = arith.constant 0 : index
    %c0_211 = arith.constant 0 : index
    %144 = vector.load %arg2[%c0_210, %c0_211] : memref<8x36xf32, #tpu.memory_space<vmem>>, vector<8x36xf32>
    %c0_212 = arith.constant 0 : index
    %c0_213 = arith.constant 0 : index
    %145 = vector.load %arg4[%c0_212, %c0_213] : memref<256x36xf32, #tpu.memory_space<vmem>>, vector<256x36xf32>
    %cst = arith.constant dense<0.000000e+00> : vector<8x256xf32>
    %146 = tpu.matmul %144, %145, %cst {dimension_numbers = #tpu.dot_dimension_numbers<[1], [1], [0], [0], [0, 0, 1, 0], [], []>} : vector<8x36xf32>, vector<256x36xf32>, vector<8x256xf32> -> vector<8x256xf32>
    %c0_214 = arith.constant 0 : index
    %c0_215 = arith.constant 0 : index
    %c0_216 = arith.constant 0 : index
    %147 = vector.load %arg3[%c0_214, %c0_215, %c0_216] : memref<1x8x256xf32, #tpu.memory_space<vmem>>, vector<1x8x256xf32>
    %148 = vector.shape_cast %147 : vector<1x8x256xf32> to vector<8x256xf32>
    %149 = vector.shape_cast %146 : vector<8x256xf32> to vector<1x8x256xf32>
    tpu.vector_store %arg3[%c0_214, %c0_215, %c0_216], %149 {strides = array<i32>} : memref<1x8x256xf32, #tpu.memory_space<vmem>>, vector<1x8x256xf32>,
    return
  }
  func.func @transform_0(%arg0: i32) -> (i32, i32, i32) {
    %c0_i32 = arith.constant 0 : i32
    %c0_i32_0 = arith.constant 0 : i32
    %c0_i32_1 = arith.constant 0 : i32
    return %arg0, %c0_i32, %c0_i32_0 : i32, i32, i32
  }
  func.func @transform_1(%arg0: i32) -> (i32, i32) {
    %c0_i32 = arith.constant 0 : i32
    %c0_i32_0 = arith.constant 0 : i32
    %c0_i32_1 = arith.constant 0 : i32
    return %c0_i32, %c0_i32_0 : i32, i32
  }
  func.func @transform_2(%arg0: i32) -> (i32, i32, i32) {
    %c0_i32 = arith.constant 0 : i32
    %c0_i32_0 = arith.constant 0 : i32
    %c0_i32_1 = arith.constant 0 : i32
    return %arg0, %c0_i32, %c0_i32_0 : i32, i32, i32
  }
}

</mosaic_0001>

<bundles_post_ra>
// kernel: tpu_custom_call.1
= control target key start
LH: loop header
LB: loop body
LE: loop exit
PB: predicated region body
PF: predicated region fallthrough
CT: control target
= control target key end

     0   :  { %7 = vsyncpa [#allocation4], 0  ;;  %s1695_s0 = inlined_call_operand.vmem [shape: f32[2,18,72], index: 0, kind: input, shape index: {}]   ;;  %s1696_s1 = inlined_call_operand.vmem [shape: f32[8,36], index: 1, kind: input, shape index: {}]   ;;  %s1697_s2 = inlined_call_operand.hbm [shape: f32[2,8,256], index: 2, kind: output, shape index: {}]  }
   0x1   :  { %9 = vsyncpa [#allocation4 + $0x1], 0  ;;  %s1266_s9 = smov 0   ;;  %s1268_s10 = smov 0  }
   0x2   :  { %s1270_s11 = smov 0   ;;  %s1272_s12 = smov 0  }
   0x3 LB: > { %s1287_s13 = sadd.s32 4294967295, %s1227_s12   ;;  %s977_s14 = sadd.s32 4294967294, %s1227_s12   ;;  %s1227_s12 = sphi %s1272_s12, %s1705_s12   ;;  %s1223_s11 = sphi %s1270_s11, %s1704_s11   ;;  %s1219_s10 = sphi %s1268_s10, %s1703_s10   ;;  %s1215_s9 = sphi %s1266_s9, %s1702_s9  }
   0x4   : > { %s1291_s15 = sadd.s32 1, %s1227_s12   ;;  %s69_s16 = sadd.s32 1, %s1223_s11 }
   0x5   : > { %s66_s17 = ssub.s32 %s1227_s12, %s1291_s15  ;;  %p79_p0 = scmp.ne.s32.totalorder %s1223_s11, %s1219_s10 }
   0x6   : > { %p67_p1 = scmp.eq.s32.totalorder %s66_s17, 0  ;;  %p80_p2 = scmp.eq.s32.totalorder %s1287_s13, 1 }
   0x7   : > { %p85_p3 = scmp.ne.s32.totalorder %s1219_s10, %s1215_s9  ;;  %p86_p4 = scmp.eq.s32.totalorder %s977_s14, 1 }
   0x8   : > { %s1302_s18 = scalar_select %p67_p1, %s1223_s11, %s69_s16  }
   0x9   : > { %p1304_p5 = por %p80_p2, %p79_p0  ;;  %p1308_p6 = por %p86_p4, %p85_p3 }
   0xa   : > { %p980_p7 = scmp.ge.s32.totalorder %s1227_s12, 1  ;;  %p115_p8 = scmp.lt.s32.totalorder %s1227_s12, 3 }
   0xc   : > { %p116_p9 = pnand %p980_p7, %p115_p8 }
   0xd   : > { %p137_p10 = scmp.lt.s32.totalorder (!%p116_p9), %s1287_s13, 1  ;;  %vm144_vm0 = vcmask (!%p116_p9), 97280   ;;  %s1229_s26 = smov (!%p116_p9), 108   ;;  %vm157_vm1 = vcmask (!%p116_p9), 195680   ;;  %vm170_vm2 = vcmask (!%p116_p9), 294080   ;;  %vm730_vm3 = vcmask (!%p116_p9), 293888  }
   0xe   : > { %119 = sbr.rel (%p116_p9) target bundleno = 563 (0x233), region = 28  ;;  %s1230_s27 = smov (!%p116_p9), 96   ;;  %vm1475_vm4 = vmpackc.low (!%p116_p9), %vm730_vm3, %vm730_vm3  ;;  %v1546_v49 = vld [vmem:[%s1696_s1] sm:$0xff] (!%p116_p9) }
   0xf   : > { %s1231_s28 = smov (!%p116_p9), 12   ;;  %s1232_s29 = smov (!%p116_p9), 120   ;;  %1054 = vmatprep.mubr.msk.f32.mxu0 (!%p116_p9), %vm730_vm3, %v1546_v49 }
  0x10   : > { %s1233_s30 = smov (!%p116_p9), 24   ;;  %s1234_s3 = smov (!%p116_p9), 92  }
  0x11   : > { %s1235_s4 = smov (!%p116_p9), 124   ;;  %s1236_s5 = smov (!%p116_p9), 104  }
  0x12   : > { %s1237_s6 = smov (!%p116_p9), 8   ;;  %s1238_s7 = smov (!%p116_p9), 116  }
  0x13   : > { %s1239_s8 = smov (!%p116_p9), 20   ;;  %s1240_s14 = smov (!%p116_p9), 88  }
  0x14   : > { %s1241_s16 = smov (!%p116_p9), 100   ;;  %s1242_s17 = smov (!%p116_p9), 4  }
  0x15   : > { %s138_s21 = scalar_select %p137_p10, %s1287_s13, 1 }
  0x16   : > { %s1245_s23 = smov 84   ;;  %s1246_s24 = smov 80  }
  0x17   : > { %s1104_s22 = smul.u32 24, %s138_s21  ;;  %s1243_s21 = smov 112  }
  0x19   : > { %s141_s25 = scalar_lea.vmem %s1695_s0, %s1104_s22  ;;  %s1244_s22 = smov 16  }
  0x1a   : > { %v1319_v0 = vld [vmem:[%s141_s25 + $0x1] sm:$0xff]  ;;  %v1331_v3 = vld [vmem:[%s141_s25 + $0x9] sm:$0xff] }
  0x1b   : > { %v1321_v1 = vld [vmem:[%s141_s25] sm:$0xff]  ;;  %425 = vrot.lane.b32.xlu1 %v1319_v0, %s1229_s26  ;;  %v1327_v2 = vld [vmem:[%s141_s25 + $0x8] sm:$0xff] }
  0x1c   : > { %413 = vrot.lane.b32.xlu0 %v1321_v1, %s1230_s27  ;;  %145 = vst.msk [vmem:[#allocation2] sm:$0xff] %vm144_vm0, %v1321_v1  ;;  %146 = vst.msk [vmem:[#allocation2 + $0x8] sm:$0xff] %vm144_vm0, %v1327_v2  ;;  %v1343_v4 = vld [vmem:[%s141_s25 + $0xa] sm:$0xff]  ;;  %v1345_v5 = vld [vmem:[%s141_s25 + $0x2] sm:$0xff]  ;;  %s1247_s25 = smov 76  }
  0x1f   : > { %427 = vrot.lane.b32.xlu1 %v1331_v3, %s1229_s26 }
  0x20   : > { %415 = vrot.lane.b32.xlu0 %v1327_v2, %s1230_s27 }
  0x23   : > { %153 = vrot.lane.b32.xlu1 %v1331_v3, %s1231_s28 }
  0x24   : > { %151 = vrot.lane.b32.xlu0 %v1319_v0, %s1231_s28 }
  0x27   : > { %439 = vrot.lane.b32.xlu1 %v1343_v4, %s1232_s29 }
  0x28   : > { %437 = vrot.lane.b32.xlu0 %v1345_v5, %s1232_s29 }
  0x2b   : > { %166 = vrot.lane.b32.xlu1 %v1343_v4, %s1233_s30 }
  0x2c   : > { %164 = vrot.lane.b32.xlu0 %v1345_v5, %s1233_s30  ;;  %s134_s30 = sand.u32 1, %s1219_s10  }
  0x2f   : > { %451 = vrot.lane.b32.xlu1 %v1327_v2, %s1234_s3 }
  0x30   : > { %449 = vrot.lane.b32.xlu0 %v1321_v1, %s1234_s3 }
  0x33   : > { %179 = vrot.lane.b32.xlu1 %v1327_v2, %s1235_s4 }
  0x34   : > { %177 = vrot.lane.b32.xlu0 %v1321_v1, %s1235_s4 }
  0x37   : > { %463 = vrot.lane.b32.xlu1 %v1331_v3, %s1236_s5 }
  0x38   : > { %461 = vrot.lane.b32.xlu0 %v1319_v0, %s1236_s5 }
  0x3b   : > { %191 = vrot.lane.b32.xlu1 %v1331_v3, %s1237_s6 }
  0x3c   : > { %189 = vrot.lane.b32.xlu0 %v1319_v0, %s1237_s6 }
  0x3f   : > { %475 = vrot.lane.b32.xlu1 %v1343_v4, %s1238_s7 }
  0x40   : > { %473 = vrot.lane.b32.xlu0 %v1345_v5, %s1238_s7 }
  0x43   : > { %203 = vrot.lane.b32.xlu1 %v1343_v4, %s1239_s8 }
  0x44   : > { %201 = vrot.lane.b32.xlu0 %v1345_v5, %s1239_s8 }
  0x47   : > { %487 = vrot.lane.b32.xlu1 %v1327_v2, %s1240_s14 }
  0x48   : > { %485 = vrot.lane.b32.xlu0 %v1321_v1, %s1240_s14 }
  0x4b   : > { %215 = vrot.lane.b32.xlu1 %v1327_v2, %s1232_s29 }
  0x4c   : > { %213 = vrot.lane.b32.xlu0 %v1321_v1, %s1232_s29 }
  0x4f   : > { %499 = vrot.lane.b32.xlu1 %v1331_v3, %s1241_s16 }
  0x50   : > { %497 = vrot.lane.b32.xlu0 %v1319_v0, %s1241_s16 }
  0x53   : > { %227 = vrot.lane.b32.xlu1 %v1331_v3, %s1242_s17 }
  0x54   : > { %225 = vrot.lane.b32.xlu0 %v1319_v0, %s1242_s17 }
  0x57   : > { %511 = vrot.lane.b32.xlu1 %v1343_v4, %s1243_s21 }
  0x58   : > { %509 = vrot.lane.b32.xlu0 %v1345_v5, %s1243_s21 }
  0x5b   : > { %239 = vrot.lane.b32.xlu1 %v1343_v4, %s1244_s22 }
  0x5c   : > { %237 = vrot.lane.b32.xlu0 %v1345_v5, %s1244_s22 }
  0x5f   : > { %523 = vrot.lane.b32.xlu1 %v1327_v2, %s1245_s23 }
  0x60   : > { %521 = vrot.lane.b32.xlu0 %v1321_v1, %s1245_s23 }
  0x63   : > { %251 = vrot.lane.b32.xlu1 %v1327_v2, %s1238_s7 }
  0x64   : > { %249 = vrot.lane.b32.xlu0 %v1321_v1, %s1238_s7 }
  0x67   : > { %535 = vrot.lane.b32.xlu1 %v1331_v3, %s1230_s27 }
  0x68   : > { %533 = vrot.lane.b32.xlu0 %v1319_v0, %s1230_s27 }
  0x6b   : > { %547 = vrot.lane.b32.xlu1 %v1343_v4, %s1229_s26 }
  0x6c   : > { %545 = vrot.lane.b32.xlu0 %v1345_v5, %s1229_s26 }
  0x6f   : > { %267 = vrot.lane.b32.xlu1 %v1343_v4, %s1231_s28 }
  0x70   : > { %265 = vrot.lane.b32.xlu0 %v1345_v5, %s1231_s28  ;;  %s1249_s28 = smov 68  }
  0x73   : > { %559 = vrot.lane.b32.xlu1 %v1327_v2, %s1246_s24 }
  0x74   : > { %557 = vrot.lane.b32.xlu0 %v1321_v1, %s1246_s24 }
  0x77   : > { %279 = vrot.lane.b32.xlu1 %v1327_v2, %s1243_s21 }
  0x78   : > { %277 = vrot.lane.b32.xlu0 %v1321_v1, %s1243_s21 }
  0x7b   : > { %571 = vrot.lane.b32.xlu1 %v1331_v3, %s1234_s3 }
  0x7c   : > { %569 = vrot.lane.b32.xlu0 %v1319_v0, %s1234_s3 }
  0x7f   : > { %291 = vrot.lane.b32.xlu1 %v1331_v3, %s1235_s4 }
  0x80   : > { %289 = vrot.lane.b32.xlu0 %v1319_v0, %s1235_s4 }
  0x83   : > { %583 = vrot.lane.b32.xlu1 %v1343_v4, %s1236_s5 }
  0x84   : > { %581 = vrot.lane.b32.xlu0 %v1345_v5, %s1236_s5 }
  0x87   : > { %303 = vrot.lane.b32.xlu1 %v1343_v4, %s1237_s6 }
  0x88   : > { %301 = vrot.lane.b32.xlu0 %v1345_v5, %s1237_s6  ;;  %s1021_s6 = sshll.u32 %s1287_s13, 8  ;;  %s1250_s13 = smov [#allocation3]  }
  0x8b   : > { %595 = vrot.lane.b32.xlu1 %v1327_v2, %s1247_s25 }
  0x8c   : > { %593 = vrot.lane.b32.xlu0 %v1321_v1, %s1247_s25 }
  0x8d   : > { %v426_v6 = vpop.permute.xlu1 %425 }
  0x8e   : > { %v414_v7 = vpop.permute.xlu0 %413 }
  0x8f   : > { %419 = vst.msk [vmem:[#allocation2 + $0x80] sm:$0xff] %vm144_vm0, %v414_v7  ;;  %315 = vrot.lane.b32.xlu1 %v1327_v2, %s1229_s26 }
  0x90   : > { %431 = vst.msk [vmem:[#allocation2 + $0x80] sm:$0xff] %vm157_vm1, %v426_v6  ;;  %313 = vrot.lane.b32.xlu0 %v1321_v1, %s1229_s26  ;;  %s1248_s26 = smov 72  }
  0x91   : > { %v428_v8 = vpop.permute.xlu1 %427 }
  0x92   : > { %v416_v9 = vpop.permute.xlu0 %415 }
  0x93   : > { %420 = vst.msk [vmem:[#allocation2 + $0x88] sm:$0xff] %vm144_vm0, %v416_v9  ;;  %607 = vrot.lane.b32.xlu1 %v1331_v3, %s1240_s14 }
  0x94   : > { %432 = vst.msk [vmem:[#allocation2 + $0x88] sm:$0xff] %vm157_vm1, %v428_v8  ;;  %605 = vrot.lane.b32.xlu0 %v1319_v0, %s1240_s14  ;;  %s1655_s14 = scalar_lea.hbm %s1697_s2, %s1021_s6 }
  0x95   : > { %v154_v10 = vpop.permute.xlu1 %153 }
  0x96   : > { %v152_v11 = vpop.permute.xlu0 %151  ;;  %159 = vst.msk [vmem:[#allocation2 + $0x8] sm:$0xff] %vm157_vm1, %v154_v10 }
  0x97   : > { %158 = vst.msk [vmem:[#allocation2] sm:$0xff] %vm157_vm1, %v152_v11  ;;  %327 = vrot.lane.b32.xlu1 %v1331_v3, %s1232_s29 }
  0x98   : > { %325 = vrot.lane.b32.xlu0 %v1319_v0, %s1232_s29 }
  0x99   : > { %v440_v12 = vpop.permute.xlu1 %439 }
  0x9a   : > { %v438_v13 = vpop.permute.xlu0 %437  ;;  %444 = vst.msk [vmem:[#allocation2 + $0x88] sm:$0xff] %vm170_vm2, %v440_v12 }
  0x9b   : > { %443 = vst.msk [vmem:[#allocation2 + $0x80] sm:$0xff] %vm170_vm2, %v438_v13  ;;  %619 = vrot.lane.b32.xlu1 %v1343_v4, %s1241_s16 }
  0x9c   : > { %617 = vrot.lane.b32.xlu0 %v1345_v5, %s1241_s16 }
  0x9d   : > { %v167_v14 = vpop.permute.xlu1 %166 }
  0x9e   : > { %v165_v15 = vpop.permute.xlu0 %164  ;;  %172 = vst.msk [vmem:[#allocation2 + $0x8] sm:$0xff] %vm170_vm2, %v167_v14 }
  0x9f   : > { %171 = vst.msk [vmem:[#allocation2] sm:$0xff] %vm170_vm2, %v165_v15  ;;  %339 = vrot.lane.b32.xlu1 %v1343_v4, %s1242_s17 }
  0xa0   : > { %337 = vrot.lane.b32.xlu0 %v1345_v5, %s1242_s17 }
  0xa1   : > { %v452_v16 = vpop.permute.xlu1 %451  ;;  %v715_v19 = vld [vmem:[#allocation2 + $0x88] sm:$0xff] }
  0xa2   : > { %v450_v17 = vpop.permute.xlu0 %449  ;;  %v714_v18 = vld [vmem:[#allocation2 + $0x80] sm:$0xff]  ;;  %456 = vst.msk [vmem:[#allocation2 + $0x98] sm:$0xff] %vm144_vm0, %v452_v16 }
  0xa3   : > { %455 = vst.msk [vmem:[#allocation2 + $0x90] sm:$0xff] %vm144_vm0, %v450_v17  ;;  %v1056_v21 = vpack.c.bf16 %v715_v19, %v714_v18  ;;  %631 = vrot.lane.b32.xlu1 %v1327_v2, %s1248_s26 }
  0xa4   : > { %629 = vrot.lane.b32.xlu0 %v1321_v1, %s1248_s26 }
  0xa5   : > { %1058 = vmatprep.subr.msk.bf16.mxu0 %vm1475_vm4, %v1056_v21  ;;  %v180_v22 = vpop.permute.xlu1 %179  ;;  %v699_v25 = vld [vmem:[#allocation2 + $0x8] sm:$0xff] }
  0xa6   : > { %v178_v23 = vpop.permute.xlu0 %177  ;;  %v698_v24 = vld [vmem:[#allocation2] sm:$0xff]  ;;  %184 = vst.msk [vmem:[#allocation2 + $0x18] sm:$0xff] %vm144_vm0, %v180_v22 }
  0xa7   : > { %183 = vst.msk [vmem:[#allocation2 + $0x10] sm:$0xff] %vm144_vm0, %v178_v23  ;;  %v1059_v26 = vpack.c.bf16 %v699_v25, %v698_v24  ;;  %351 = vrot.lane.b32.xlu1 %v1327_v2, %s1236_s5 }
  0xa8   : > { %349 = vrot.lane.b32.xlu0 %v1321_v1, %s1236_s5 }
  0xa9   : > { %1061 = vmatpush3.bf16.xpose.msk.msra.mxu0 %vm1475_vm4, %v1059_v26  ;;  %v464_v27 = vpop.permute.xlu1 %463 }
  0xaa   : > { %v462_v28 = vpop.permute.xlu0 %461  ;;  %468 = vst.msk [vmem:[#allocation2 + $0x98] sm:$0xff] %vm157_vm1, %v464_v27 }
  0xab   : > { %467 = vst.msk [vmem:[#allocation2 + $0x90] sm:$0xff] %vm157_vm1, %v462_v28  ;;  %643 = vrot.lane.b32.xlu1 %v1331_v3, %s1245_s23 }
  0xac   : > { %641 = vrot.lane.b32.xlu0 %v1319_v0, %s1245_s23 }
  0xad   : > { %v192_v29 = vpop.permute.xlu1 %191 }
  0xae   : > { %v190_v30 = vpop.permute.xlu0 %189  ;;  %196 = vst.msk [vmem:[#allocation2 + $0x18] sm:$0xff] %vm157_vm1, %v192_v29 }
  0xaf   : > { %195 = vst.msk [vmem:[#allocation2 + $0x10] sm:$0xff] %vm157_vm1, %v190_v30  ;;  %363 = vrot.lane.b32.xlu1 %v1331_v3, %s1238_s7 }
  0xb0   : > { %361 = vrot.lane.b32.xlu0 %v1319_v0, %s1238_s7 }
  0xb1   : > { %v476_v31 = vpop.permute.xlu1 %475 }
  0xb2   : > { %v474_v32 = vpop.permute.xlu0 %473  ;;  %480 = vst.msk [vmem:[#allocation2 + $0x98] sm:$0xff] %vm170_vm2, %v476_v31 }
  0xb3   : > { %479 = vst.msk [vmem:[#allocation2 + $0x90] sm:$0xff] %vm170_vm2, %v474_v32  ;;  %655 = vrot.lane.b32.xlu1 %v1343_v4, %s1230_s27 }
  0xb4   : > { %653 = vrot.lane.b32.xlu0 %v1345_v5, %s1230_s27 }
  0xb5   : > { %v204_v33 = vpop.permute.xlu1 %203 }
  0xb6   : > { %v202_v34 = vpop.permute.xlu0 %201  ;;  %208 = vst.msk [vmem:[#allocation2 + $0x18] sm:$0xff] %vm170_vm2, %v204_v33 }
  0xb7   : > { %207 = vst.msk [vmem:[#allocation2 + $0x10] sm:$0xff] %vm170_vm2, %v202_v34  ;;  %667 = vrot.lane.b32.xlu1 %v1327_v2, %s1249_s28 }
  0xb8   : > { %665 = vrot.lane.b32.xlu0 %v1321_v1, %s1249_s28 }
  0xb9   : > { %v488_v35 = vpop.permute.xlu1 %487  ;;  %v717_v38 = vld [vmem:[#allocation2 + $0x98] sm:$0xff] }
  0xba   : > { %v486_v36 = vpop.permute.xlu0 %485  ;;  %v716_v37 = vld [vmem:[#allocation2 + $0x90] sm:$0xff]  ;;  %492 = vst.msk [vmem:[#allocation2 + $0xa8] sm:$0xff] %vm144_vm0, %v488_v35 }
  0xbb   : > { %491 = vst.msk [vmem:[#allocation2 + $0xa0] sm:$0xff] %vm144_vm0, %v486_v36  ;;  %v1062_v39 = vpack.c.bf16 %v717_v38, %v716_v37  ;;  %379 = vrot.lane.b32.xlu1 %v1327_v2, %s1241_s16 }
  0xbc   : > { %377 = vrot.lane.b32.xlu0 %v1321_v1, %s1241_s16  ;;  %s904_s16 = scalar_lea.sflag [#allocation4], %s134_s30 }
  0xbd   : > { %1064 = vmatprep.subr.msk.bf16.mxu0 %vm1475_vm4, %v1062_v39  ;;  %v216_v40 = vpop.permute.xlu1 %215  ;;  %v701_v43 = vld [vmem:[#allocation2 + $0x18] sm:$0xff] }
  0xbe   : > { %v214_v41 = vpop.permute.xlu0 %213  ;;  %v700_v42 = vld [vmem:[#allocation2 + $0x10] sm:$0xff]  ;;  %220 = vst.msk [vmem:[#allocation2 + $0x28] sm:$0xff] %vm144_vm0, %v216_v40 }
  0xbf   : > { %219 = vst.msk [vmem:[#allocation2 + $0x20] sm:$0xff] %vm144_vm0, %v214_v41  ;;  %v1065_v44 = vpack.c.bf16 %v701_v43, %v700_v42  ;;  %679 = vrot.lane.b32.xlu1 %v1331_v3, %s1246_s24 }
  0xc0   : > { %677 = vrot.lane.b32.xlu0 %v1319_v0, %s1246_s24 }
  0xc1   : > { %1067 = vmatpush3.bf16.xpose.msk.msra.mxu0 %vm1475_vm4, %v1065_v44  ;;  %v500_v45 = vpop.permute.xlu1 %499 }
  0xc2   : > { %v498_v46 = vpop.permute.xlu0 %497  ;;  %504 = vst.msk [vmem:[#allocation2 + $0xa8] sm:$0xff] %vm157_vm1, %v500_v45 }
  0xc3   : > { %503 = vst.msk [vmem:[#allocation2 + $0xa0] sm:$0xff] %vm157_vm1, %v498_v46  ;;  %391 = vrot.lane.b32.xlu1 %v1331_v3, %s1243_s21 }
  0xc4   : > { %389 = vrot.lane.b32.xlu0 %v1319_v0, %s1243_s21  ;;  %s1169_s21 = sshll.u32 %s1250_s13, 4  ;;  %s1170_s21 = int_to_ptr.vmem [resolvable:$false] %s1169_s21 }
  0xc5   : > { %v228_v47 = vpop.permute.xlu1 %227  ;;  %s1171_s22 = scalar_lea.vmem %s1170_s21, 512 }
  0xc6   : > { %v226_v48 = vpop.permute.xlu0 %225  ;;  %232 = vst.msk [vmem:[#allocation2 + $0x28] sm:$0xff] %vm157_vm1, %v228_v47 }
  0xc7   : > { %231 = vst.msk [vmem:[#allocation2 + $0x20] sm:$0xff] %vm157_vm1, %v226_v48  ;;  %691 = vrot.lane.b32.xlu1 %v1343_v4, %s1234_s3 }
  0xc8   : > { %689 = vrot.lane.b32.xlu0 %v1345_v5, %s1234_s3  ;;  %s981_s3 = sshll.u32 %s134_s30, 4 }
  0xc9   : > { %v512_v50 = vpop.permute.xlu1 %511 }
  0xca   : > { %v510_v51 = vpop.permute.xlu0 %509  ;;  %516 = vst.msk [vmem:[#allocation2 + $0xa8] sm:$0xff] %vm170_vm2, %v512_v50 }
  0xcb   : > { %515 = vst.msk [vmem:[#allocation2 + $0xa0] sm:$0xff] %vm170_vm2, %v510_v51  ;;  %403 = vrot.lane.b32.xlu1 %v1343_v4, %s1235_s4 }
  0xcc   : > { %401 = vrot.lane.b32.xlu0 %v1345_v5, %s1235_s4  ;;  %s136_s4 = scalar_lea.vmem [#allocation3], %s981_s3 }
  0xcd   : > { %v240_v52 = vpop.permute.xlu1 %239  ;;  %s918_s5 = sshll.u32 %s136_s4, 4  ;;  %s1650_s5 = int_to_ptr.vmem [resolvable:$true] %s918_s5 }
  0xce   : > { %v238_v53 = vpop.permute.xlu0 %237  ;;  %244 = vst.msk [vmem:[#allocation2 + $0x28] sm:$0xff] %vm170_vm2, %v240_v52  ;;  %s1165_s17 = scalar_lea.vmem %s1650_s5, 256  ;;  %p1172_p0 = scmp.lt.s32.totalorder %s1650_s5, %s1170_s21 }
  0xcf   : > { %243 = vst.msk [vmem:[#allocation2 + $0x20] sm:$0xff] %vm170_vm2, %v238_v53  ;;  %p1166_p11 = scmp.ne.s32.totalorder %s1650_s5, %s1165_s17  ;;  %p1173_p1 = scmp.lt.s32.totalorder %s1171_s22, %s1165_s17 }
  0xd1   : > { %v524_v54 = vpop.permute.xlu1 %523  ;;  %v719_v57 = vld [vmem:[#allocation2 + $0xa8] sm:$0xff]  ;;  %p1167_p12 = pnand %p1166_p11, %p1304_p5  ;;  %p1174_p2 = por %p1173_p1, %p1172_p0 }
  0xd2   : > { %v522_v55 = vpop.permute.xlu0 %521  ;;  %v718_v56 = vld [vmem:[#allocation2 + $0xa0] sm:$0xff]  ;;  %528 = vst.msk [vmem:[#allocation2 + $0xb8] sm:$0xff] %vm144_vm0, %v524_v54 }
  0xd3   : > { %527 = vst.msk [vmem:[#allocation2 + $0xb0] sm:$0xff] %vm144_vm0, %v522_v55  ;;  %v1068_v58 = vpack.c.bf16 %v719_v57, %v718_v56  ;;  %p1168_p13 = pneg %p1167_p12 }
  0xd5   : > { %1070 = vmatprep.subr.msk.bf16.mxu0 %vm1475_vm4, %v1068_v58  ;;  %v252_v59 = vpop.permute.xlu1 %251  ;;  %v703_v62 = vld [vmem:[#allocation2 + $0x28] sm:$0xff]  ;;  %p1175_p3 = pnand %p1174_p2, %p1168_p13 }
  0xd6   : > { %v250_v60 = vpop.permute.xlu0 %249  ;;  %v702_v61 = vld [vmem:[#allocation2 + $0x20] sm:$0xff]  ;;  %256 = vst.msk [vmem:[#allocation2 + $0x38] sm:$0xff] %vm144_vm0, %v252_v59 }
  0xd7   : > { %255 = vst.msk [vmem:[#allocation2 + $0x30] sm:$0xff] %vm144_vm0, %v250_v60  ;;  %v1071_v63 = vpack.c.bf16 %v703_v62, %v702_v61 }
  0xd8   : > { %260 = vst.msk [vmem:[#allocation2 + $0x38] sm:$0xff] %vm157_vm1, %v1331_v3  ;;  %259 = vst.msk [vmem:[#allocation2 + $0x30] sm:$0xff] %vm157_vm1, %v1319_v0 }
  0xd9   : > { %1073 = vmatpush3.bf16.xpose.msk.msra.mxu0 %vm1475_vm4, %v1071_v63  ;;  %v536_v1 = vpop.permute.xlu1 %535 }
  0xda   : > { %v534_v2 = vpop.permute.xlu0 %533  ;;  %540 = vst.msk [vmem:[#allocation2 + $0xb8] sm:$0xff] %vm157_vm1, %v536_v1 }
  0xdb   : > { %539 = vst.msk [vmem:[#allocation2 + $0xb0] sm:$0xff] %vm157_vm1, %v534_v2 }
  0xdd   : > { %v548_v6 = vpop.permute.xlu1 %547 }
  0xde   : > { %v546_v7 = vpop.permute.xlu0 %545  ;;  %552 = vst.msk [vmem:[#allocation2 + $0xb8] sm:$0xff] %vm170_vm2, %v548_v6 }
  0xdf   : > { %551 = vst.msk [vmem:[#allocation2 + $0xb0] sm:$0xff] %vm170_vm2, %v546_v7 }
  0xe1   : > { %v268_v8 = vpop.permute.xlu1 %267 }
  0xe2   : > { %v266_v3 = vpop.permute.xlu0 %265  ;;  %272 = vst.msk [vmem:[#allocation2 + $0x38] sm:$0xff] %vm170_vm2, %v268_v8 }
  0xe3   : > { %271 = vst.msk [vmem:[#allocation2 + $0x30] sm:$0xff] %vm170_vm2, %v266_v3 }
  0xe5   : > { %v560_v0 = vpop.permute.xlu1 %559  ;;  %v721_v11 = vld [vmem:[#allocation2 + $0xb8] sm:$0xff] }
  0xe6   : > { %v558_v9 = vpop.permute.xlu0 %557  ;;  %v720_v10 = vld [vmem:[#allocation2 + $0xb0] sm:$0xff]  ;;  %564 = vst.msk [vmem:[#allocation2 + $0xc8] sm:$0xff] %vm144_vm0, %v560_v0 }
  0xe7   : > { %563 = vst.msk [vmem:[#allocation2 + $0xc0] sm:$0xff] %vm144_vm0, %v558_v9  ;;  %v1074_v12 = vpack.c.bf16 %v721_v11, %v720_v10 }
  0xe9   : > { %1076 = vmatprep.subr.msk.bf16.mxu0 %vm1475_vm4, %v1074_v12  ;;  %v280_v13 = vpop.permute.xlu1 %279  ;;  %v705_v16 = vld [vmem:[#allocation2 + $0x38] sm:$0xff] }
  0xea   : > { %v278_v14 = vpop.permute.xlu0 %277  ;;  %v704_v15 = vld [vmem:[#allocation2 + $0x30] sm:$0xff]  ;;  %284 = vst.msk [vmem:[#allocation2 + $0x48] sm:$0xff] %vm144_vm0, %v280_v13 }
  0xeb   : > { %283 = vst.msk [vmem:[#allocation2 + $0x40] sm:$0xff] %vm144_vm0, %v278_v14  ;;  %v1077_v17 = vpack.c.bf16 %v705_v16, %v704_v15 }
  0xed   : > { %1079 = vmatpush3.bf16.xpose.msk.msra.mxu0 %vm1475_vm4, %v1077_v17  ;;  %v572_v18 = vpop.permute.xlu1 %571 }
  0xee   : > { %v570_v19 = vpop.permute.xlu0 %569  ;;  %576 = vst.msk [vmem:[#allocation2 + $0xc8] sm:$0xff] %vm157_vm1, %v572_v18 }
  0xef   : > { %575 = vst.msk [vmem:[#allocation2 + $0xc0] sm:$0xff] %vm157_vm1, %v570_v19 }
  0xf1   : > { %v292_v21 = vpop.permute.xlu1 %291 }
  0xf2   : > { %v290_v22 = vpop.permute.xlu0 %289  ;;  %296 = vst.msk [vmem:[#allocation2 + $0x48] sm:$0xff] %vm157_vm1, %v292_v21 }
  0xf3   : > { %295 = vst.msk [vmem:[#allocation2 + $0x40] sm:$0xff] %vm157_vm1, %v290_v22 }
  0xf5   : > { %v584_v23 = vpop.permute.xlu1 %583 }
  0xf6   : > { %v582_v24 = vpop.permute.xlu0 %581  ;;  %588 = vst.msk [vmem:[#allocation2 + $0xc8] sm:$0xff] %vm170_vm2, %v584_v23 }
  0xf7   : > { %587 = vst.msk [vmem:[#allocation2 + $0xc0] sm:$0xff] %vm170_vm2, %v582_v24 }
  0xf9   : > { %v304_v25 = vpop.permute.xlu1 %303 }
  0xfa   : > { %v302_v26 = vpop.permute.xlu0 %301  ;;  %308 = vst.msk [vmem:[#allocation2 + $0x48] sm:$0xff] %vm170_vm2, %v304_v25 }
  0xfb   : > { %307 = vst.msk [vmem:[#allocation2 + $0x40] sm:$0xff] %vm170_vm2, %v302_v26 }
  0xfd   : > { %v596_v27 = vpop.permute.xlu1 %595  ;;  %v723_v30 = vld [vmem:[#allocation2 + $0xc8] sm:$0xff] }
  0xfe   : > { %v594_v28 = vpop.permute.xlu0 %593  ;;  %v722_v29 = vld [vmem:[#allocation2 + $0xc0] sm:$0xff]  ;;  %600 = vst.msk [vmem:[#allocation2 + $0xd8] sm:$0xff] %vm144_vm0, %v596_v27 }
  0xff   : > { %599 = vst.msk [vmem:[#allocation2 + $0xd0] sm:$0xff] %vm144_vm0, %v594_v28  ;;  %v1080_v31 = vpack.c.bf16 %v723_v30, %v722_v29 }
 0x101   : > { %1082 = vmatprep.subr.msk.bf16.mxu0 %vm1475_vm4, %v1080_v31  ;;  %v316_v32 = vpop.permute.xlu1 %315  ;;  %v707_v35 = vld [vmem:[#allocation2 + $0x48] sm:$0xff] }
 0x102   : > { %v314_v33 = vpop.permute.xlu0 %313  ;;  %v706_v34 = vld [vmem:[#allocation2 + $0x40] sm:$0xff]  ;;  %320 = vst.msk [vmem:[#allocation2 + $0x58] sm:$0xff] %vm144_vm0, %v316_v32 }
 0x103   : > { %319 = vst.msk [vmem:[#allocation2 + $0x50] sm:$0xff] %vm144_vm0, %v314_v33  ;;  %v1083_v36 = vpack.c.bf16 %v707_v35, %v706_v34 }
 0x105   : > { %1085 = vmatpush3.bf16.xpose.msk.msra.mxu0 %vm1475_vm4, %v1083_v36  ;;  %v608_v37 = vpop.permute.xlu1 %607 }
 0x106   : > { %v606_v38 = vpop.permute.xlu0 %605  ;;  %612 = vst.msk [vmem:[#allocation2 + $0xd8] sm:$0xff] %vm157_vm1, %v608_v37 }
 0x107   : > { %611 = vst.msk [vmem:[#allocation2 + $0xd0] sm:$0xff] %vm157_vm1, %v606_v38 }
 0x109   : > { %v328_v39 = vpop.permute.xlu1 %327 }
 0x10a   : > { %v326_v40 = vpop.permute.xlu0 %325  ;;  %332 = vst.msk [vmem:[#allocation2 + $0x58] sm:$0xff] %vm157_vm1, %v328_v39 }
 0x10b   : > { %331 = vst.msk [vmem:[#allocation2 + $0x50] sm:$0xff] %vm157_vm1, %v326_v40 }
 0x10d   : > { %v620_v41 = vpop.permute.xlu1 %619 }
 0x10e   : > { %v618_v42 = vpop.permute.xlu0 %617  ;;  %624 = vst.msk [vmem:[#allocation2 + $0xd8] sm:$0xff] %vm170_vm2, %v620_v41 }
 0x10f   : > { %623 = vst.msk [vmem:[#allocation2 + $0xd0] sm:$0xff] %vm170_vm2, %v618_v42 }
 0x111   : > { %v340_v43 = vpop.permute.xlu1 %339 }
 0x112   : > { %v338_v44 = vpop.permute.xlu0 %337  ;;  %344 = vst.msk [vmem:[#allocation2 + $0x58] sm:$0xff] %vm170_vm2, %v340_v43 }
 0x113   : > { %343 = vst.msk [vmem:[#allocation2 + $0x50] sm:$0xff] %vm170_vm2, %v338_v44 }
 0x115   : > { %v632_v45 = vpop.permute.xlu1 %631  ;;  %v725_v48 = vld [vmem:[#allocation2 + $0xd8] sm:$0xff] }
 0x116   : > { %v630_v46 = vpop.permute.xlu0 %629  ;;  %v724_v47 = vld [vmem:[#allocation2 + $0xd0] sm:$0xff]  ;;  %636 = vst.msk [vmem:[#allocation2 + $0xe8] sm:$0xff] %vm144_vm0, %v632_v45 }
 0x117   : > { %635 = vst.msk [vmem:[#allocation2 + $0xe0] sm:$0xff] %vm144_vm0, %v630_v46  ;;  %v1086_v50 = vpack.c.bf16 %v725_v48, %v724_v47 }
 0x119   : > { %1088 = vmatprep.subr.msk.bf16.mxu0 %vm1475_vm4, %v1086_v50  ;;  %v352_v51 = vpop.permute.xlu1 %351  ;;  %v709_v54 = vld [vmem:[#allocation2 + $0x58] sm:$0xff] }
 0x11a   : > { %v350_v52 = vpop.permute.xlu0 %349  ;;  %v708_v53 = vld [vmem:[#allocation2 + $0x50] sm:$0xff]  ;;  %356 = vst.msk [vmem:[#allocation2 + $0x68] sm:$0xff] %vm144_vm0, %v352_v51 }
 0x11b   : > { %355 = vst.msk [vmem:[#allocation2 + $0x60] sm:$0xff] %vm144_vm0, %v350_v52  ;;  %v1089_v55 = vpack.c.bf16 %v709_v54, %v708_v53 }
 0x11d   : > { %1091 = vmatpush3.bf16.xpose.msk.msra.mxu0 %vm1475_vm4, %v1089_v55  ;;  %v644_v56 = vpop.permute.xlu1 %643 }
 0x11e   : > { %v642_v57 = vpop.permute.xlu0 %641  ;;  %648 = vst.msk [vmem:[#allocation2 + $0xe8] sm:$0xff] %vm157_vm1, %v644_v56 }
 0x11f   : > { %647 = vst.msk [vmem:[#allocation2 + $0xe0] sm:$0xff] %vm157_vm1, %v642_v57 }
 0x121   : > { %v364_v58 = vpop.permute.xlu1 %363 }
 0x122   : > { %v362_v59 = vpop.permute.xlu0 %361  ;;  %368 = vst.msk [vmem:[#allocation2 + $0x68] sm:$0xff] %vm157_vm1, %v364_v58 }
 0x123   : > { %367 = vst.msk [vmem:[#allocation2 + $0x60] sm:$0xff] %vm157_vm1, %v362_v59 }
 0x124   : > { %372 = vst.msk [vmem:[#allocation2 + $0x68] sm:$0xff] %vm170_vm2, %v1343_v4  ;;  %371 = vst.msk [vmem:[#allocation2 + $0x60] sm:$0xff] %vm170_vm2, %v1345_v5 }
 0x125   : > { %v656_v60 = vpop.permute.xlu1 %655 }
 0x126   : > { %v654_v61 = vpop.permute.xlu0 %653  ;;  %660 = vst.msk [vmem:[#allocation2 + $0xe8] sm:$0xff] %vm170_vm2, %v656_v60 }
 0x127   : > { %659 = vst.msk [vmem:[#allocation2 + $0xe0] sm:$0xff] %vm170_vm2, %v654_v61 }
 0x129   : > { %v668_v62 = vpop.permute.xlu1 %667 }
 0x12a   : > { %v666_v63 = vpop.permute.xlu0 %665  ;;  %672 = vst.msk [vmem:[#allocation2 + $0xf8] sm:$0xff] %vm144_vm0, %v668_v62 }
 0x12b   : > { %671 = vst.msk [vmem:[#allocation2 + $0xf0] sm:$0xff] %vm144_vm0, %v666_v63  ;;  %v710_v1 = vld [vmem:[#allocation2 + $0x60] sm:$0xff]  ;;  %v711_v2 = vld [vmem:[#allocation2 + $0x68] sm:$0xff] }
 0x12c   : > { %v1095_v3 = vpack.c.bf16 %v711_v2, %v710_v1 }
 0x12d   : > { %v380_v6 = vpop.permute.xlu1 %379  ;;  %v727_v8 = vld [vmem:[#allocation2 + $0xe8] sm:$0xff] }
 0x12e   : > { %v378_v7 = vpop.permute.xlu0 %377  ;;  %v726_v4 = vld [vmem:[#allocation2 + $0xe0] sm:$0xff]  ;;  %384 = vst.msk [vmem:[#allocation2 + $0x78] sm:$0xff] %vm144_vm0, %v380_v6 }
 0x12f   : > { %383 = vst.msk [vmem:[#allocation2 + $0x70] sm:$0xff] %vm144_vm0, %v378_v7  ;;  %v1092_v5 = vpack.c.bf16 %v727_v8, %v726_v4 }
 0x131   : > { %1094 = vmatprep.subr.msk.bf16.mxu0 %vm1475_vm4, %v1092_v5  ;;  %v680_v0 = vpop.permute.xlu1 %679 }
 0x132   : > { %v678_v9 = vpop.permute.xlu0 %677  ;;  %1097 = vmatpush3.bf16.xpose.msk.msra.mxu0 %vm1475_vm4, %v1095_v3  ;;  %684 = vst.msk [vmem:[#allocation2 + $0xf8] sm:$0xff] %vm157_vm1, %v680_v0 }
 0x133   : > { %683 = vst.msk [vmem:[#allocation2 + $0xf0] sm:$0xff] %vm157_vm1, %v678_v9 }
 0x135   : > { %v392_v10 = vpop.permute.xlu1 %391 }
 0x136   : > { %v390_v11 = vpop.permute.xlu0 %389  ;;  %396 = vst.msk [vmem:[#allocation2 + $0x78] sm:$0xff] %vm157_vm1, %v392_v10 }
 0x137   : > { %395 = vst.msk [vmem:[#allocation2 + $0x70] sm:$0xff] %vm157_vm1, %v390_v11 }
 0x139   : > { %v692_v12 = vpop.permute.xlu1 %691 }
 0x13a   : > { %v690_v13 = vpop.permute.xlu0 %689  ;;  %696 = vst.msk [vmem:[#allocation2 + $0xf8] sm:$0xff] %vm170_vm2, %v692_v12 }
 0x13b   : > { %695 = vst.msk [vmem:[#allocation2 + $0xf0] sm:$0xff] %vm170_vm2, %v690_v13 }
 0x13d   : > { %v404_v14 = vpop.permute.xlu1 %403 }
 0x13e   : > { %v402_v15 = vpop.permute.xlu0 %401  ;;  %408 = vst.msk [vmem:[#allocation2 + $0x78] sm:$0xff] %vm170_vm2, %v404_v14 }
 0x13f   : > { %407 = vst.msk [vmem:[#allocation2 + $0x70] sm:$0xff] %vm170_vm2, %v402_v15 }
 0x141   : > { %v729_v17 = vld [vmem:[#allocation2 + $0xf8] sm:$0xff] }
 0x142   : > { %v728_v16 = vld [vmem:[#allocation2 + $0xf0] sm:$0xff] }
 0x143   : > { %v1098_v18 = vpack.c.bf16 %v729_v17, %v728_v16 }
 0x145   : > { %1100 = vmatprep.subr.msk.bf16.mxu0 %vm1475_vm4, %v1098_v18  ;;  %v713_v21 = vld [vmem:[#allocation2 + $0x78] sm:$0xff] }
 0x146   : > { %v712_v19 = vld [vmem:[#allocation2 + $0x70] sm:$0xff] }
 0x147   : > { %v1101_v22 = vpack.c.bf16 %v713_v21, %v712_v19 }
 0x149   : > { %1103 = vmatpush3.bf16.xpose.msk.msra.mxu0 %vm1475_vm4, %v1101_v22 }
 0x150   : > { %1055 = vmatmul.mubr.msk.f32.vlgmr.msra.gmra.mrb[0].mxu0 %vm730_vm3, %v1546_v49 }
 0x223   : > { %v896_v23 = vpop.f32.mrb[0].mxu0 }
 0x224   : > { %901 = vst [vmem:[%s136_s4] sm:$0xff] %v896_v23  ;;  %v898_v20 = vpop.f32.mrb[1].mxu0 }
 0x225   : > { %902 = vst [vmem:[%s136_s4 + $0x8] sm:$0xff] %v898_v20 }
 0x226   : > { %1178 = shalt.err (!%p1175_p3)
}
 0x227   : > { %s1179_s23 = scalar_lea.hbm %s1655_s14, 256  ;;  %s1183_s26 = scalar_lea.hbm %s1697_s2, 512 }
 0x228   : > { %p1180_p4 = scmp.ne.s32.totalorder %s1655_s14, %s1179_s23  ;;  %p1184_p9 = scmp.lt.u32.totalorder %s1655_s14, %s1697_s2 }
 0x229   : > { %p1185_p10 = scmp.lt.u32.totalorder %s1183_s26, %s1179_s23  ;;  %p1187_p12 = scmp.lt.u32.totalorder %s1179_s23, %s1655_s14 }
 0x22a   : > { %p1181_p7 = pnand %p1180_p4, %p1304_p5 }
 0x22b   : > { %p1186_p11 = por %p1185_p10, %p1184_p9 }
 0x22c   : > { %p1182_p8 = pneg %p1181_p7 }
 0x22d   : > { %p1188_p13 = por %p1187_p12, %p1186_p11 }
 0x22f   : > { %p1189_p0 = pnand %p1188_p13, %p1182_p8 }
 0x231   : > { %1192 = shalt.err (!%p1189_p0)
}
 0x232   : > { %1105 = dma.vmem_to_hbm [thread:$0]  (%p1304_p5), %s1650_s5, 256, %s1655_s14, %s904_s16  }
 0x233 PF: > { %p1111_p1 = scmp.ge.s32.totalorder %s1227_s12, 2  ;;  %s930_s29 = sand.u32 1, %s1215_s9  }
 0x234   : > { %s931_s30 = scalar_lea.sflag [#allocation4], %s930_s29 }
 0x235   : > { %p1108_p2 = pnand %p1111_p1, %p1308_p6 }
 0x237   : > { %1210 = dma.done.wait (!%p1108_p2), %s931_s30, 256  }
 0x238   : > { %1212 = vsyncadd (!%p1108_p2), %s931_s30, 4294967040  ;;  %p12_p3 = scmp.ge.s32.totalorder %s1291_s15, 4   ;;  %s1702_s9 = smov %s1219_s10 }
 0x239   : > { %s1703_s10 = smov %s1223_s11  ;;  %s1704_s11 = smov %s1302_s18 }
 0x23a   : > { %s1705_s12 = smov %s1291_s15  ;;  %14 = sbr.rel (!%p12_p3) target bundleno = 3 (0x3), region = 63 }
 0x241   :  { %936 = vsyncpa [#allocation4], 1 }
 0x242   :  { %938 = vsyncpa [#allocation4 + $0x1], 1 }

</bundles_post_ra>
